<compile_context>
chip_gen: v7x
topology: tpu7x:2x2x1
jax: 0.10.0
libtpu: 0.0.40
codegen_flags: <defaults>
</compile_context>

<pallas_src>
import functools

import jax
import jax.numpy as jnp
from jax import lax
from jax.experimental import pallas as pl
from jax.experimental.pallas import tpu as pltpu


def _triplet_loss_kernel(emb1_ref, emb2_ref, out_ref, acc_ref, *,
                         margin, eps, n_valid, tm, use_bf16):
    i = pl.program_id(0)
    n_steps = pl.num_programs(0)

    # Resident full emb2 -> normalize (O(N*D) VPU work, negligible vs. tm*N*D matmul).
    e2 = emb2_ref[...].astype(jnp.float32)                    # (N_pad, D)
    e2n = e2 * lax.rsqrt(jnp.sum(e2 * e2, axis=-1, keepdims=True) + eps)

    # Current row tile of emb1 -> normalize.
    e1 = emb1_ref[...].astype(jnp.float32)                    # (tm, D)
    e1n = e1 * lax.rsqrt(jnp.sum(e1 * e1, axis=-1, keepdims=True) + eps)

    # Matching rows of emb2 for this tile's diagonal terms.
    start = pl.multiple_of(i * tm, tm)
    e2d = emb2_ref[pl.ds(start, tm), :].astype(jnp.float32)   # (tm, D)
    e2dn = e2d * lax.rsqrt(jnp.sum(e2d * e2d, axis=-1, keepdims=True) + eps)

    # d1[r] = <e1n[r], e2n[start + r]>; fold margin in once per row.
    d1m = jnp.sum(e1n * e2dn, axis=-1, keepdims=True) - margin  # (tm, 1)

    if use_bf16:
        lhs = e1n.astype(jnp.bfloat16)
        rhs = e2n.astype(jnp.bfloat16)
    else:
        lhs, rhs = e1n, e2n
    # scores[r, c] = <e1n_tile[r], e2n[c]> : contract on D of both operands (no transpose).
    scores = lax.dot_general(
        lhs, rhs,
        dimension_numbers=(((1,), (1,)), ((), ())),
        preferred_element_type=jnp.float32,
    )                                                          # (tm, N_pad)

    cost = jnp.maximum(scores - d1m, 0.0)

    n_pad = scores.shape[1]
    if n_valid != n_pad:
        # Only emitted when the wrapper had to zero-pad rows to a tile multiple.
        row_ids = start + lax.broadcasted_iota(jnp.int32, (tm, 1), 0)
        col_ids = lax.broadcasted_iota(jnp.int32, (1, n_pad), 1)
        cost = jnp.where((row_ids < n_valid) & (col_ids < n_valid), cost, 0.0)

    partial = jnp.sum(cost)

    @pl.when(i == 0)
    def _():
        acc_ref[0] = 0.0

    acc_ref[0] += partial

    @pl.when(i == n_steps - 1)
    def _():
        out_ref[0, 0] = acc_ref[0]


def triplet_loss(emb1, emb2, margin=0.0, eps=1e-12, *,
                 row_tile=256, use_bf16_matmul=False):
    """Pallas TPU implementation of TripletLoss.forward(emb1, emb2)."""
    assert emb1.shape == emb2.shape and emb1.ndim == 2
    N, D = emb1.shape

    if N <= row_tile:
        tm, n_pad = N, N
        e1p, e2p = emb1, emb2
    else:
        tm = row_tile
        n_pad = tm * ((N + tm - 1) // tm)
        pad = n_pad - N
        e1p = jnp.pad(emb1, ((0, pad), (0, 0)))
        e2p = jnp.pad(emb2, ((0, pad), (0, 0)))

    kernel = functools.partial(
        _triplet_loss_kernel,
        margin=float(margin), eps=float(eps),
        n_valid=N, tm=tm, use_bf16=use_bf16_matmul,
    )

    out = pl.pallas_call(
        kernel,
        out_shape=jax.ShapeDtypeStruct((1, 1), jnp.float32),
        grid_spec=pltpu.PrefetchScalarGridSpec(
            num_scalar_prefetch=0,
            grid=(n_pad // tm,),
            in_specs=[
                pl.BlockSpec((tm, D), lambda i: (i, 0)),      # emb1 row tile
                pl.BlockSpec((n_pad, D), lambda i: (0, 0)),   # emb2 resident
            ],
            out_specs=pl.BlockSpec(memory_space=pltpu.SMEM),
            scratch_shapes=[pltpu.SMEM((1,), jnp.float32)],
        ),
        compiler_params=pltpu.CompilerParams(
            dimension_semantics=("arbitrary",),
        ),
    )(e1p, e2p)
    return out[0, 0]


def _reference(emb1, emb2, margin=0.0, eps=1e-12):
    e1 = emb1 / jnp.sqrt(jnp.sum(emb1**2, axis=-1, keepdims=True) + eps)
    e2 = emb2 / jnp.sqrt(jnp.sum(emb2**2, axis=-1, keepdims=True) + eps)
    scores = e1 @ e2.T
    d1 = jnp.diag(scores)[:, None]
    cost = jnp.maximum(margin + scores - d1, 0.0)
    return jnp.sum(cost)


if __name__ == "__main__":
    key = jax.random.PRNGKey(0)
    margin = 0.2

    # Small shape implied by the module (batch of embedding pairs).
    k1, k2 = jax.random.split(key)
    N, D = 8, 32
    emb1 = jax.random.normal(k1, (N, D), dtype=jnp.float32)
    emb2 = jax.random.normal(k2, (N, D), dtype=jnp.float32)

    loss = triplet_loss(emb1, emb2, margin=margin)
    jax.block_until_ready(loss)
    ref = _reference(emb1, emb2, margin=margin)
    assert jnp.allclose(loss, ref, rtol=1e-5, atol=1e-5), (loss, ref)

    # Exercise the gridded / padded path (N > row_tile, ragged).
    k3, k4 = jax.random.split(k2)
    N2, D2 = 300, 64
    emb1b = jax.random.normal(k3, (N2, D2), dtype=jnp.float32)
    emb2b = jax.random.normal(k4, (N2, D2), dtype=jnp.float32)
    loss2 = triplet_loss(emb1b, emb2b, margin=margin)
    jax.block_until_ready(loss2)
    ref2 = _reference(emb1b, emb2b, margin=margin)
    assert jnp.allclose(loss2, ref2, rtol=1e-4, atol=1e-4), (loss2, ref2)

    print("KERNEL_OK")
</pallas_src>

<mosaic_0001>
module attributes {stable_mosaic.version = 11 : i64} {
  func.func @_triplet_loss_kernel(%arg0: i32, %arg1: memref<8x32xf32, #tpu.memory_space<vmem>>, %arg2: memref<8x32xf32, #tpu.memory_space<vmem>>, %arg3: memref<1x1xf32, #tpu.memory_space<smem>>, %arg4: memref<1xf32, #tpu.memory_space<smem>>) attributes {dimension_semantics = [#tpu.dimension_semantics<arbitrary>], iteration_bounds = array<i64: 1>, scalar_prefetch = 0 : i64, scratch_operands = 1 : i64, tpu.core_type = #tpu.core_type<tc>, window_params = [{transform_indices = @transform_0, window_bounds = array<i64: 8, 32>}, {pipeline_mode = #tpu.pipeline_mode<synchronous>, transform_indices = @transform_1, window_bounds = array<i64: 8, 32>}, {transform_indices = @transform_2, window_bounds = array<i64: 1, 1>}]} {
    %c0 = arith.constant 0 : index
    %c0_0 = arith.constant 0 : index
    %0 = vector.load %arg2[%c0, %c0_0] : memref<8x32xf32, #tpu.memory_space<vmem>>, vector<8x32xf32>
    %1 = arith.mulf %0, %0 : vector<8x32xf32>
    %cst = arith.constant dense<0.000000e+00> : vector<8xf32>
    %2 = vector.multi_reduction <add>, %1, %cst [1] : vector<8x32xf32> to vector<8xf32>
    %3 = vector.shape_cast %2 : vector<8xf32> to vector<8x1xf32>
    %cst_1 = arith.constant 9.99999996E-13 : f32
    %4 = vector.broadcast %cst_1 : f32 to vector<8x1xf32>
    %5 = arith.addf %3, %4 : vector<8x1xf32>
    %6 = math.rsqrt %5 : vector<8x1xf32>
    %7 = vector.broadcast %6 : vector<8x1xf32> to vector<8x32xf32>
    %8 = arith.mulf %0, %7 : vector<8x32xf32>
    %c0_2 = arith.constant 0 : index
    %c0_3 = arith.constant 0 : index
    %9 = vector.load %arg1[%c0_2, %c0_3] : memref<8x32xf32, #tpu.memory_space<vmem>>, vector<8x32xf32>
    %10 = arith.mulf %9, %9 : vector<8x32xf32>
    %cst_4 = arith.constant dense<0.000000e+00> : vector<8xf32>
    %11 = vector.multi_reduction <add>, %10, %cst_4 [1] : vector<8x32xf32> to vector<8xf32>
    %12 = vector.shape_cast %11 : vector<8xf32> to vector<8x1xf32>
    %cst_5 = arith.constant 9.99999996E-13 : f32
    %13 = vector.broadcast %cst_5 : f32 to vector<8x1xf32>
    %14 = arith.addf %12, %13 : vector<8x1xf32>
    %15 = math.rsqrt %14 : vector<8x1xf32>
    %16 = vector.broadcast %15 : vector<8x1xf32> to vector<8x32xf32>
    %17 = arith.mulf %9, %16 : vector<8x32xf32>
    %c8_i32 = arith.constant 8 : i32
    %18 = arith.muli %arg0, %c8_i32 : i32
    %19 = tpu.assume_multiple %18, 8 : i32
    %20 = arith.index_cast %19 : i32 to index
    %c0_6 = arith.constant 0 : index
    %21 = vector.load %arg2[%20, %c0_6] : memref<8x32xf32, #tpu.memory_space<vmem>>, vector<8x32xf32>
    %22 = arith.mulf %21, %21 : vector<8x32xf32>
    %cst_7 = arith.constant dense<0.000000e+00> : vector<8xf32>
    %23 = vector.multi_reduction <add>, %22, %cst_7 [1] : vector<8x32xf32> to vector<8xf32>
    %24 = vector.shape_cast %23 : vector<8xf32> to vector<8x1xf32>
    %cst_8 = arith.constant 9.99999996E-13 : f32
    %25 = vector.broadcast %cst_8 : f32 to vector<8x1xf32>
    %26 = arith.addf %24, %25 : vector<8x1xf32>
    %27 = math.rsqrt %26 : vector<8x1xf32>
    %28 = vector.broadcast %27 : vector<8x1xf32> to vector<8x32xf32>
    %29 = arith.mulf %21, %28 : vector<8x32xf32>
    %30 = arith.mulf %17, %29 : vector<8x32xf32>
    %cst_9 = arith.constant dense<0.000000e+00> : vector<8xf32>
    %31 = vector.multi_reduction <add>, %30, %cst_9 [1] : vector<8x32xf32> to vector<8xf32>
    %32 = vector.shape_cast %31 : vector<8xf32> to vector<8x1xf32>
    %cst_10 = arith.constant 2.000000e-01 : f32
    %33 = vector.broadcast %cst_10 : f32 to vector<8x1xf32>
    %34 = arith.subf %32, %33 : vector<8x1xf32>
    %cst_11 = arith.constant dense<0.000000e+00> : vector<8x8xf32>
    %35 = tpu.matmul %17, %8, %cst_11 {dimension_numbers = #tpu.dot_dimension_numbers<[1], [1], [0], [0], [0, 0, 1, 0], [], []>} : vector<8x32xf32>, vector<8x32xf32>, vector<8x8xf32> -> vector<8x8xf32>
    %36 = vector.broadcast %34 : vector<8x1xf32> to vector<8x8xf32>
    %37 = arith.subf %35, %36 : vector<8x8xf32>
    %cst_12 = arith.constant 0.000000e+00 : f32
    %38 = vector.broadcast %cst_12 : f32 to vector<8x8xf32>
    %39 = arith.maximumf %37, %38 : vector<8x8xf32>
    %40 = vector.shape_cast %39 : vector<8x8xf32> to vector<1x8x8xf32>
    %cst_13 = arith.constant dense<0.000000e+00> : vector<1xf32>
    %41 = vector.multi_reduction <add>, %40, %cst_13 [1, 2] : vector<1x8x8xf32> to vector<1xf32>
    %42 = vector.shape_cast %41 : vector<1xf32> to vector<1x1x1xf32>
    %43 = vector.extract %42[0, 0, 0] : f32 from vector<1x1x1xf32>
    %c0_i32 = arith.constant 0 : i32
    %44 = arith.cmpi eq, %arg0, %c0_i32 : i32
    %45 = arith.extui %44 : i1 to i32
    %c0_i32_14 = arith.constant 0 : i32
    %46 = arith.cmpi ne, %45, %c0_i32_14 : i32
    scf.if %46 {
      %cst_19 = arith.constant 0.000000e+00 : f32
      %c0_20 = arith.constant 0 : index
      %53 = memref.load %arg4[%c0_20] : memref<1xf32, #tpu.memory_space<smem>>
      memref.store %cst_19, %arg4[%c0_20] : memref<1xf32, #tpu.memory_space<smem>>
    } else {
    }
    %c0_15 = arith.constant 0 : index
    %47 = memref.load %arg4[%c0_15] : memref<1xf32, #tpu.memory_space<smem>>
    %48 = arith.addf %47, %43 : f32
    %c0_16 = arith.constant 0 : index
    %49 = memref.load %arg4[%c0_16] : memref<1xf32, #tpu.memory_space<smem>>
    memref.store %48, %arg4[%c0_16] : memref<1xf32, #tpu.memory_space<smem>>
    %c0_i32_17 = arith.constant 0 : i32
    %50 = arith.cmpi eq, %arg0, %c0_i32_17 : i32
    %51 = arith.extui %50 : i1 to i32
    %c0_i32_18 = arith.constant 0 : i32
    %52 = arith.cmpi ne, %51, %c0_i32_18 : i32
    scf.if %52 {
      %c0_19 = arith.constant 0 : index
      %53 = memref.load %arg4[%c0_19] : memref<1xf32, #tpu.memory_space<smem>>
      %c0_20 = arith.constant 0 : index
      %c0_21 = arith.constant 0 : index
      %54 = memref.load %arg3[%c0_20, %c0_21] : memref<1x1xf32, #tpu.memory_space<smem>>
      memref.store %53, %arg3[%c0_20, %c0_21] : memref<1x1xf32, #tpu.memory_space<smem>>
    } else {
    }
    return
  }
  func.func @transform_0(%arg0: i32) -> (i32, i32) {
    %c0_i32 = arith.constant 0 : i32
    %c0_i32_0 = arith.constant 0 : i32
    return %arg0, %c0_i32 : i32, i32
  }
  func.func @transform_1(%arg0: i32) -> (i32, i32) {
    %c0_i32 = arith.constant 0 : i32
    %c0_i32_0 = arith.constant 0 : i32
    %c0_i32_1 = arith.constant 0 : i32
    return %c0_i32, %c0_i32_0 : i32, i32
  }
  func.func @transform_2(%arg0: i32) -> (i32, i32) {
    %c0_i32 = arith.constant 0 : i32
    %c0_i32_0 = arith.constant 0 : i32
    %c0_i32_1 = arith.constant 0 : i32
    return %c0_i32, %c0_i32_0 : i32, i32
  }
}

</mosaic_0001>

<bundles_post_ra>
// kernel: tpu_custom_call.1
= control target key start
LH: loop header
LB: loop body
LE: loop exit
PB: predicated region body
PF: predicated region fallthrough
CT: control target
= control target key end

     0   :  { %7 = vsyncpa [#allocation4], 0  ;;  %s332_s0 = inlined_call_operand.hbm [shape: f32[8,32], index: 0, kind: input, shape index: {}]   ;;  %s333_s1 = inlined_call_operand.hbm [shape: f32[8,32], index: 1, kind: input, shape index: {}]   ;;  %s334_s2 = inlined_call_operand.hbm [shape: f32[1,1], index: 2, kind: output, shape index: {}]  }
   0x1   :  { %8 = vsyncpa [#allocation7], 0 }
   0x2   :  { %9 = vsyncpa [#allocation5], 0  ;;  %s271_s9 = smov [#allocation3]   ;;  %s272_s11 = smov [#allocation6]  }
   0x3   :  { %s16_s10 = sshll.u32 %s271_s9, 4  ;;  %s26_s12 = sshll.u32 %s272_s11, 4  ;;  %s17_s10 = int_to_ptr.vmem [resolvable:$true] %s16_s10  ;;  %s27_s12 = int_to_ptr.vmem [resolvable:$true] %s26_s12 }
   0x4   :  { %s211_s15 = scalar_lea.hbm %s332_s0, 128 }
   0x5   :  { %p212_p0 = scmp.ne.s32.totalorder %s332_s0, %s211_s15  ;;  %p215_p1 = scmp.lt.u32.totalorder %s211_s15, %s332_s0 }
   0x7   :  { %p217_p2 = pnand %p215_p1, %p212_p0 }
   0x9   :  { %220 = shalt.err (!%p217_p2)
}
   0xa   :  { %s221_s20 = scalar_lea.vmem %s17_s10, 128  ;;  %p226_p4 = scmp.lt.s32.totalorder %s17_s10, %s17_s10 }
   0xb   :  { %p222_p3 = scmp.ne.s32.totalorder %s17_s10, %s221_s20  ;;  %p227_p5 = scmp.lt.s32.totalorder %s221_s20, %s221_s20 }
   0xd   :  { %p228_p6 = por %p227_p5, %p226_p4 }
   0xf   :  { %p229_p7 = pnand %p228_p6, %p222_p3 }
  0x11   :  { %232 = shalt.err (!%p229_p7)
}
  0x12   :  { %19 = dma.hbm_to_vmem [thread:$0]  %s332_s0, 128, %s17_s10, [#allocation4]  }
  0x13   :  { %s233_s25 = scalar_lea.hbm %s333_s1, 128 }
  0x14   :  { %p234_p8 = scmp.ne.s32.totalorder %s333_s1, %s233_s25  ;;  %p237_p9 = scmp.lt.u32.totalorder %s233_s25, %s333_s1 }
  0x16   :  { %p239_p10 = pnand %p237_p9, %p234_p8 }
  0x18   :  { %242 = shalt.err (!%p239_p10)
}
  0x19   :  { %s243_s30 = scalar_lea.vmem %s27_s12, 128  ;;  %p248_p12 = scmp.lt.s32.totalorder %s27_s12, %s27_s12 }
  0x1a   :  { %p244_p11 = scmp.ne.s32.totalorder %s27_s12, %s243_s30  ;;  %p249_p13 = scmp.lt.s32.totalorder %s243_s30, %s243_s30 }
  0x1c   :  { %p250_p0 = por %p249_p13, %p248_p12 }
  0x1e   :  { %p251_p1 = pnand %p250_p0, %p244_p11 }
  0x20   :  { %254 = shalt.err (!%p251_p1)
}
  0x21   :  { %29 = dma.hbm_to_vmem [thread:$0]  %s333_s1, 128, %s27_s12, [#allocation7]  }
  0x22   :  { %265 = dma.done.wait [#allocation4], 128  }
  0x23   :  { %266 = vsyncadd [#allocation4], 4294967168 }
  0x24   :  { %267 = dma.done.wait [#allocation7], 128  }
  0x25   :  { %268 = vsyncadd [#allocation7], 4294967168  ;;  %v36_v0 = vld [vmem:[#allocation6] sm:$0xff]  ;;  %vm38_vm0 = vcmask 261120   ;;  %v45_v1 = vld [vmem:[#allocation3] sm:$0xff]  ;;  %v273_v6 = vmov 0.0  }
  0x26   :  { %v37_v2 = vmul.f32 %v36_v0, %v36_v0  ;;  %v46_v3 = vmul.f32 %v45_v1, %v45_v1  ;;  %193 = vmatprep.subr.mxu0 %v273_v6  ;;  %vm274_vm1 = vmmov 0   ;;  %vm146_vm2 = vcmask 64512   ;;  %s255_s6 = scalar_lea.hbm %s334_s2, 16 }
  0x27   :  { %195 = vmatprep.mubr.msk.f32.mxu0 %vm274_vm1, %v273_v6  ;;  %p256_p2 = scmp.ne.s32.totalorder %s334_s2, %s255_s6  ;;  %p259_p3 = scmp.lt.u32.totalorder %s255_s6, %s334_s2 }
  0x28   :  { %v39_v4 = vsel %vm38_vm0, %v37_v2, 0.0  ;;  %v47_v5 = vsel %vm38_vm0, %v46_v3, 0.0 }
  0x29   :  { %40 = vadd.xlane.f32.xlu0 %v39_v4  ;;  %58 = vadd.xlane.f32.xlu1 %v39_v4  ;;  %p261_p4 = pnand %p259_p3, %p256_p2 }
  0x2d   :  { %48 = vadd.xlane.f32.xlu0 %v47_v5 }
  0xb6   :  { %v41_v7 = vpop.xlane.xlu0 %40  ;;  %v59_v8 = vpop.xlane.xlu1 %58 }
  0xb7   :  { %v42_v9 = vadd.f32 1e-12, %v41_v7  ;;  %v60_v10 = vadd.f32 1e-12, %v59_v8 }
  0xb9   :  { %205 = vrsqrt.f32 %v42_v9 }
  0xba   :  { %207 = vrsqrt.f32 %v60_v10  ;;  %v49_v11 = vpop.xlane.xlu0 %48 }
  0xbb   :  { %v50_v12 = vadd.f32 1e-12, %v49_v11 }
  0xbd   :  { %209 = vrsqrt.f32 %v50_v12 }
  0xc3   :  { %v206_v13 = vpop.eup %205 }
  0xc4   :  { %v208_v14 = vpop.eup %207  ;;  %v44_v15 = vmul.f32 %v206_v13, %v36_v0 }
  0xc5   :  { %v62_v16 = vmul.f32 %v208_v14, %v36_v0 }
  0xc6   :  { %194 = vmatpush3.xpose.msk.msra.mxu0 %vm38_vm0, %v44_v15 }
  0xc7   :  { %v210_v17 = vpop.eup %209 }
  0xc8   :  { %v52_v18 = vmul.f32 %v210_v17, %v45_v1 }
  0xca   :  { %196 = vmatmul.mubr.msk.f32.vlgmr.msra.gmra.mrb[0].mxu0 %vm38_vm0, %v52_v18  ;;  %v63_v19 = vmul.f32 %v62_v16, %v52_v18 }
  0xcc   :  { %v64_v20 = vsel %vm38_vm0, %v63_v19, 0.0 }
  0xcd   :  { %65 = vadd.xlane.f32.xlu1 %v64_v20 }
 0x15a   :  { %v66_v21 = vpop.xlane.xlu1 %65 }
 0x15b   :  { %v188_v22 = vadd.f32 -0.2, %v66_v21 }
 0x19d   :  { %v140_v23 = vpop.f32.mrb[0].mxu0 }
 0x19e   :  { %v144_v24 = vsub.f32 %v140_v23, %v188_v22  ;;  %v197_v25 = vpop.f32.mrb[1].mxu0 }
 0x1a0   :  { %v145_v26 = vmax.f32 %v144_v24, 0.0 }
 0x1a2   :  { %v147_v27 = vsel %vm146_vm2, %v145_v26, 0.0 }
 0x1a3   :  { %148 = vadd.xlane.f32.xlu0 %v147_v27 }
 0x230   :  { %v149_v28 = vpop.xlane.xlu0 %148 }
 0x231   :  { %v150_v29 = vrot.slane %v149_v28, 4 }
 0x233   :  { %v151_v30 = vadd.f32 %v150_v29, %v149_v28 }
 0x235   :  { %v152_v31 = vrot.slane %v151_v30, 2 }
 0x237   :  { %v153_v32 = vadd.f32 %v152_v31, %v151_v30 }
 0x239   :  { %v154_v33 = vrot.slane %v153_v32, 1 }
 0x23b   :  { %v155_v34 = vadd.f32 %v154_v33, %v153_v32 }
 0x23d   :  { %198 = vpush %v155_v34 }
 0x26e   :  { %s199_s1 = spop %198 }
 0x26f   :  { %172 = sst [smem:[#allocation8]] %s199_s1 }
 0x270   :  { %264 = shalt.err (!%p261_p4)
}
 0x271   :  { %s275_s11 = smov [#allocation8]  }
 0x272   :  { %180 = dma.smem_to_hbm %s275_s11, 16, %s334_s2, [#allocation5]  }
 0x273   :  { %269 = dma.done.wait [#allocation5], 16  }
 0x274   :  { %270 = vsyncadd [#allocation5], 4294967280 }
 0x275   :  { %184 = sfence }
 0x276   :  { %185 = vsyncpa [#allocation4], 1 }
 0x277   :  { %186 = vsyncpa [#allocation7], 1 }
 0x278   :  { %187 = vsyncpa [#allocation5], 1 }

</bundles_post_ra>
